<compile_context>
chip_gen: v6e
topology: v6e:2x2x1
jax: 0.10.0
libtpu: 0.0.40
codegen_flags: <defaults>
</compile_context>

<pallas_src>
import functools

import jax
import jax.numpy as jnp
from jax.experimental import pallas as pl
from jax.experimental.pallas import tpu as pltpu

EPS = 1e-5
CONV_DTYPE = jnp.float32          # set to jnp.bfloat16 on v6e/v7x for 2x MXU rate
VMEM_LIMIT = 32 * 1024 * 1024     # explicit scoped-VMEM budget (v7x-safe)


# ---------------------------------------------------------------------------
# Wrapper-side weight preparation: 3x3 conv -> block-Toeplitz matmul weight.
# ---------------------------------------------------------------------------
def _toeplitz_conv_weight(w_oihw, W):
    """PyTorch [Cout, Cin, 3, 3] conv weight -> block-Toeplitz [3*W*Cin, W*Cout].

    With a lane-dense, row-zero-padded activation scratch
        pad[r, w_in*Cin + ci]   (r = 0..H+1, rows 0 and H+1 are zero)
    and LHS
        A[h, kh*W*Cin + w_in*Cin + ci] = pad[h+kh, w_in*Cin + ci],
    (A @ T)[h, w*Cout + co] equals the 3x3 / stride-1 / pad-1 conv output.
    Column padding is folded into T (out-of-range taps have no entry).
    """
    Cout, Cin, KH, KW = w_oihw.shape
    wk = jnp.transpose(w_oihw, (2, 3, 1, 0)).astype(jnp.float32)   # [3,3,Cin,Cout]
    blocks = []
    for kh in range(KH):
        tk = jnp.zeros((W, Cin, W, Cout), jnp.float32)
        for kw in range(KW):
            # sel[w, w_in] = 1  iff  w_in == w + kw - 1  (pad-1 tap position)
            sel = jnp.eye(W, W, k=kw - 1, dtype=jnp.float32)
            tk = tk + jnp.einsum('wu,io->uiwo', sel, wk[kh, kw])
        blocks.append(tk)
    t = jnp.stack(blocks, axis=0)                                  # [3,W,Cin,W,Cout]
    return t.reshape(3 * W * Cin, W * Cout)


# ---------------------------------------------------------------------------
# Kernels
# ---------------------------------------------------------------------------
def _conv_stats_kernel(x_ref, t_ref, scale_ref, shift_ref,
                       y_ref, stats_ref, pad_ref, *, H, W, C, apply_relu):
    """One image per grid step (lane-dense [H, W*C] activations):
         a     = x * scale + shift   (+ ReLU for the second conv)
         y     = conv3x3(a)          via a single [H,3WC]@[3WC,WC] matmul
         stats = [sum_h(y), sum_h(y*y)]   per-(w,c) partial BN sums
    """
    WC = W * C

    # pre-conv affine (identity for conv1, BN1 scale/shift for conv2); f32 VPU
    a = x_ref[0] * scale_ref[...] + shift_ref[...]                 # [H, W*C]
    if apply_relu:
        a = jnp.maximum(a, 0.0)

    # zero only the two padding rows (column padding lives in the weight);
    # done every step so it is megacore-safe and never relies on stale scratch
    zero_row = jnp.zeros((1, WC), pad_ref.dtype)
    pad_ref[0:1, :] = zero_row
    pad_ref[H + 1:H + 2, :] = zero_row
    pad_ref[1:H + 1, :] = a.astype(pad_ref.dtype)

    # ONE matmul per conv: 3 row-shifted lane-dense slices, concatenated on
    # lane-group boundaries -> LHS [H, 3*W*C]
    lhs = jnp.concatenate([pad_ref[kh:kh + H, :] for kh in range(3)], axis=1)
    y = jnp.dot(lhs, t_ref[...], preferred_element_type=jnp.float32)  # [H, W*C]

    y_ref[0] = y                                                   # lane-dense store
    # BN partial statistics fused into the conv epilogue (single pass over y)
    stats_ref[0, 0:1, :] = jnp.sum(y, axis=0, keepdims=True)
    stats_ref[0, 1:2, :] = jnp.sum(y * y, axis=0, keepdims=True)


def _finalize_kernel(y_ref, x_ref, scale_ref, shift_ref, o_ref):
    """out = ReLU(scale*y + shift + x): BN2 affine + residual + ReLU, lane-dense."""
    o_ref[0] = jnp.maximum(
        y_ref[0] * scale_ref[...] + shift_ref[...] + x_ref[0], 0.0)


# ---------------------------------------------------------------------------
# pallas_call builders
# ---------------------------------------------------------------------------
def _conv_pass(x, t, scale_row, shift_row, *, H, W, C, apply_relu):
    N = x.shape[0]
    WC = W * C
    kernel = functools.partial(_conv_stats_kernel, H=H, W=W, C=C,
                               apply_relu=apply_relu)
    flops = 2 * N * H * (3 * WC) * WC + 6 * N * H * WC
    bytes_accessed = 4 * (x.size + t.size + 2 * WC + N * H * WC + N * 2 * WC)
    return pl.pallas_call(
        kernel,
        grid=(N,),
        in_specs=[
            pl.BlockSpec((1, H, WC), lambda n: (n, 0, 0)),     # x tile (pipelined)
            pl.BlockSpec((3 * WC, WC), lambda n: (0, 0)),      # Toeplitz weight (resident)
            pl.BlockSpec((1, WC), lambda n: (0, 0)),           # scale row (resident)
            pl.BlockSpec((1, WC), lambda n: (0, 0)),           # shift row (resident)
        ],
        out_specs=(
            pl.BlockSpec((1, H, WC), lambda n: (n, 0, 0)),     # conv output
            pl.BlockSpec((1, 2, WC), lambda n: (n, 0, 0)),     # partial BN sums
        ),
        out_shape=(
            jax.ShapeDtypeStruct((N, H, WC), jnp.float32),
            jax.ShapeDtypeStruct((N, 2, WC), jnp.float32),
        ),
        scratch_shapes=[pltpu.VMEM((H + 2, WC), CONV_DTYPE)],  # padded activation
        compiler_params=pltpu.CompilerParams(
            dimension_semantics=("parallel",),                 # megacore on v7x
            vmem_limit_bytes=VMEM_LIMIT),
        cost_estimate=pl.CostEstimate(flops=flops, transcendentals=0,
                                      bytes_accessed=bytes_accessed),
    )(x, t, scale_row, shift_row)


def _finalize_pass(y, x, scale_row, shift_row, *, H, W, C):
    N = y.shape[0]
    WC = W * C
    return pl.pallas_call(
        _finalize_kernel,
        grid=(N,),
        in_specs=[
            pl.BlockSpec((1, H, WC), lambda n: (n, 0, 0)),
            pl.BlockSpec((1, H, WC), lambda n: (n, 0, 0)),
            pl.BlockSpec((1, WC), lambda n: (0, 0)),
            pl.BlockSpec((1, WC), lambda n: (0, 0)),
        ],
        out_specs=pl.BlockSpec((1, H, WC), lambda n: (n, 0, 0)),
        out_shape=jax.ShapeDtypeStruct((N, H, WC), jnp.float32),
        compiler_params=pltpu.CompilerParams(
            dimension_semantics=("parallel",),
            vmem_limit_bytes=VMEM_LIMIT),
        cost_estimate=pl.CostEstimate(
            flops=4 * N * H * WC, transcendentals=0,
            bytes_accessed=4 * (3 * N * H * WC + 2 * WC)),
    )(y, x, scale_row, shift_row)


def _bn_scale_shift(stats, gamma, beta, count, W, C):
    """Finalize training-mode BN from per-image partial sums.

    stats: [N, 2, W*C] = per-image [sum_h(y), sum_h(y*y)] in the lane-dense
    (w, c) layout.  Returns (scale, shift) rows of shape [1, W*C]:
    scale = gamma * rsqrt(var + eps), shift = beta - mean * scale.
    """
    s = jnp.sum(stats, axis=0).reshape(2, W, C).sum(axis=1)        # [2, C]
    mean = s[0] / count
    var = s[1] / count - mean * mean                               # biased variance
    scale_c = gamma.astype(jnp.float32) * jax.lax.rsqrt(var + EPS)
    shift_c = beta.astype(jnp.float32) - mean * scale_c
    return (jnp.tile(scale_c, W).reshape(1, W * C),
            jnp.tile(shift_c, W).reshape(1, W * C))


# ---------------------------------------------------------------------------
# Full IdentityBlock forward
# ---------------------------------------------------------------------------
def identity_block(x_nchw, w1, g1, b1, w2, g2, b2):
    """x_nchw: [N,C,H,W] f32; w*: [Cout,Cin,3,3] (PyTorch layout); g/b: [C]."""
    N, C, H, W = x_nchw.shape
    WC = W * C
    count = N * H * W

    # NCHW -> lane-dense [N, H, W*C]
    x = jnp.transpose(x_nchw, (0, 2, 3, 1)).reshape(N, H, WC).astype(jnp.float32)

    t1 = _toeplitz_conv_weight(w1, W).astype(CONV_DTYPE)
    t2 = _toeplitz_conv_weight(w2, W).astype(CONV_DTYPE)

    ones = jnp.ones((1, WC), jnp.float32)
    zeros = jnp.zeros((1, WC), jnp.float32)

    # pass 1: conv1 + per-image partial BN1 sums
    y1, stats1 = _conv_pass(x, t1, ones, zeros, H=H, W=W, C=C, apply_relu=False)
    scale1, shift1 = _bn_scale_shift(stats1, g1, b1, count, W, C)

    # pass 2: BN1 + ReLU + conv2 + per-image partial BN2 sums
    y2, stats2 = _conv_pass(y1, t2, scale1, shift1, H=H, W=W, C=C, apply_relu=True)
    scale2, shift2 = _bn_scale_shift(stats2, g2, b2, count, W, C)

    # pass 3: BN2 + residual + ReLU
    out = _finalize_pass(y2, x, scale2, shift2, H=H, W=W, C=C)

    return jnp.transpose(out.reshape(N, H, W, C), (0, 3, 1, 2))    # back to NCHW


# ---------------------------------------------------------------------------
# Pure-JAX reference (NCHW), mirrors the PyTorch module in train mode.
# ---------------------------------------------------------------------------
def reference_identity_block(x, w1, g1, b1, w2, g2, b2):
    def conv(x, w):
        return jax.lax.conv_general_dilated(
            x, w, window_strides=(1, 1), padding="SAME",
            dimension_numbers=("NCHW", "OIHW", "NCHW"))

    def bn(y, g, b):
        mean = jnp.mean(y, axis=(0, 2, 3), keepdims=True)
        var = jnp.mean((y - mean) ** 2, axis=(0, 2, 3), keepdims=True)
        return ((y - mean) * jax.lax.rsqrt(var + EPS)
                * g.reshape(1, -1, 1, 1) + b.reshape(1, -1, 1, 1))

    y = jax.nn.relu(bn(conv(x, w1), g1, b1))
    y = bn(conv(y, w2), g2, b2)
    return jax.nn.relu(y + x)


if __name__ == "__main__":
    key = jax.random.PRNGKey(0)
    N, C, H, W = 2, 8, 16, 16   # in_channels == out_channels; W*C = 128 lanes
    ks = jax.random.split(key, 7)

    x = jax.random.normal(ks[0], (N, C, H, W), jnp.float32)
    w1 = 0.1 * jax.random.normal(ks[1], (C, C, 3, 3), jnp.float32)
    w2 = 0.1 * jax.random.normal(ks[2], (C, C, 3, 3), jnp.float32)
    g1 = 1.0 + 0.1 * jax.random.normal(ks[3], (C,), jnp.float32)
    b1 = 0.1 * jax.random.normal(ks[4], (C,), jnp.float32)
    g2 = 1.0 + 0.1 * jax.random.normal(ks[5], (C,), jnp.float32)
    b2 = 0.1 * jax.random.normal(ks[6], (C,), jnp.float32)

    out = identity_block(x, w1, g1, b1, w2, g2, b2)
    out = jax.block_until_ready(out)

    ref = reference_identity_block(x, w1, g1, b1, w2, g2, b2)
    max_err = float(jnp.max(jnp.abs(out - ref)))
    assert jnp.allclose(out, ref, atol=2e-3, rtol=2e-3), f"max_err={max_err}"

    print("KERNEL_OK")
</pallas_src>

<mosaic_0001>
module attributes {stable_mosaic.version = 11 : i64} {
  func.func @_conv_stats_kernel(%arg0: i32, %arg1: memref<1x16x128xf32, #tpu.memory_space<vmem>>, %arg2: memref<384x128xf32, #tpu.memory_space<vmem>>, %arg3: memref<1x128xf32, #tpu.memory_space<vmem>>, %arg4: memref<1x128xf32, #tpu.memory_space<vmem>>, %arg5: memref<1x16x128xf32, #tpu.memory_space<vmem>>, %arg6: memref<1x2x128xf32, #tpu.memory_space<vmem>>, %arg7: memref<18x128xf32, #tpu.memory_space<vmem>>) attributes {dimension_semantics = [#tpu.dimension_semantics<parallel>], iteration_bounds = array<i64: 2>, scalar_prefetch = 0 : i64, scratch_operands = 1 : i64, tpu.core_type = #tpu.core_type<tc>, window_params = [{transform_indices = @transform_0, window_bounds = array<i64: 1, 16, 128>}, {pipeline_mode = #tpu.pipeline_mode<synchronous>, transform_indices = @transform_1, window_bounds = array<i64: 384, 128>}, {pipeline_mode = #tpu.pipeline_mode<synchronous>, transform_indices = @transform_2, window_bounds = array<i64: 1, 128>}, {pipeline_mode = #tpu.pipeline_mode<synchronous>, transform_indices = @transform_3, window_bounds = array<i64: 1, 128>}, {transform_indices = @transform_4, window_bounds = array<i64: 1, 16, 128>}, {transform_indices = @transform_5, window_bounds = array<i64: 1, 2, 128>}]} {
    %c0 = arith.constant 0 : index
    %c0_0 = arith.constant 0 : index
    %c0_1 = arith.constant 0 : index
    %0 = vector.load %arg1[%c0, %c0_0, %c0_1] : memref<1x16x128xf32, #tpu.memory_space<vmem>>, vector<1x16x128xf32>
    %1 = vector.shape_cast %0 : vector<1x16x128xf32> to vector<16x128xf32>
    %c0_2 = arith.constant 0 : index
    %c0_3 = arith.constant 0 : index
    %2 = vector.load %arg3[%c0_2, %c0_3] : memref<1x128xf32, #tpu.memory_space<vmem>>, vector<1x128xf32>
    %3 = vector.broadcast %2 : vector<1x128xf32> to vector<16x128xf32>
    %4 = arith.mulf %1, %3 : vector<16x128xf32>
    %c0_4 = arith.constant 0 : index
    %c0_5 = arith.constant 0 : index
    %5 = vector.load %arg4[%c0_4, %c0_5] : memref<1x128xf32, #tpu.memory_space<vmem>>, vector<1x128xf32>
    %6 = vector.broadcast %5 : vector<1x128xf32> to vector<16x128xf32>
    %7 = arith.addf %4, %6 : vector<16x128xf32>
    %cst = arith.constant 0.000000e+00 : f32
    %8 = vector.broadcast %cst : f32 to vector<1x128xf32>
    %c0_6 = arith.constant 0 : index
    %c0_7 = arith.constant 0 : index
    %9 = vector.load %arg7[%c0_6, %c0_7] : memref<18x128xf32, #tpu.memory_space<vmem>>, vector<1x128xf32>
    tpu.vector_store %arg7[%c0_6, %c0_7], %8 {strides = array<i32>} : memref<18x128xf32, #tpu.memory_space<vmem>>, vector<1x128xf32>,
    %c17 = arith.constant 17 : index
    %c0_8 = arith.constant 0 : index
    %10 = vector.load %arg7[%c17, %c0_8] : memref<18x128xf32, #tpu.memory_space<vmem>>, vector<1x128xf32>
    tpu.vector_store %arg7[%c17, %c0_8], %8 {strides = array<i32>} : memref<18x128xf32, #tpu.memory_space<vmem>>, vector<1x128xf32>,
    %c1 = arith.constant 1 : index
    %c0_9 = arith.constant 0 : index
    %11 = vector.load %arg7[%c1, %c0_9] : memref<18x128xf32, #tpu.memory_space<vmem>>, vector<16x128xf32>
    tpu.vector_store %arg7[%c1, %c0_9], %7 {strides = array<i32>} : memref<18x128xf32, #tpu.memory_space<vmem>>, vector<16x128xf32>,
    %c0_10 = arith.constant 0 : index
    %c0_11 = arith.constant 0 : index
    %12 = vector.load %arg7[%c0_10, %c0_11] : memref<18x128xf32, #tpu.memory_space<vmem>>, vector<16x128xf32>
    %c1_12 = arith.constant 1 : index
    %c0_13 = arith.constant 0 : index
    %13 = vector.load %arg7[%c1_12, %c0_13] : memref<18x128xf32, #tpu.memory_space<vmem>>, vector<16x128xf32>
    %c2 = arith.constant 2 : index
    %c0_14 = arith.constant 0 : index
    %14 = vector.load %arg7[%c2, %c0_14] : memref<18x128xf32, #tpu.memory_space<vmem>>, vector<16x128xf32>
    %15 = tpu.concatenate %12, %13, %14 in 1 : vector<16x128xf32>, vector<16x128xf32>, vector<16x128xf32> -> vector<16x384xf32>
    %c0_15 = arith.constant 0 : index
    %c0_16 = arith.constant 0 : index
    %16 = vector.load %arg2[%c0_15, %c0_16] : memref<384x128xf32, #tpu.memory_space<vmem>>, vector<384x128xf32>
    %cst_17 = arith.constant dense<0.000000e+00> : vector<16x128xf32>
    %17 = tpu.matmul %15, %16, %cst_17 {dimension_numbers = #tpu.dot_dimension_numbers<[1], [0], [0], [1], [0, 0, 1, 1], [], []>} : vector<16x384xf32>, vector<384x128xf32>, vector<16x128xf32> -> vector<16x128xf32>
    %c0_18 = arith.constant 0 : index
    %c0_19 = arith.constant 0 : index
    %c0_20 = arith.constant 0 : index
    %18 = vector.load %arg5[%c0_18, %c0_19, %c0_20] : memref<1x16x128xf32, #tpu.memory_space<vmem>>, vector<1x16x128xf32>
    %19 = vector.shape_cast %18 : vector<1x16x128xf32> to vector<16x128xf32>
    %20 = vector.shape_cast %17 : vector<16x128xf32> to vector<1x16x128xf32>
    tpu.vector_store %arg5[%c0_18, %c0_19, %c0_20], %20 {strides = array<i32>} : memref<1x16x128xf32, #tpu.memory_space<vmem>>, vector<1x16x128xf32>,
    %cst_21 = arith.constant dense<0.000000e+00> : vector<128xf32>
    %21 = vector.multi_reduction <add>, %17, %cst_21 [0] : vector<16x128xf32> to vector<128xf32>
    %22 = vector.shape_cast %21 : vector<128xf32> to vector<1x128xf32>
    %c0_22 = arith.constant 0 : index
    %c0_23 = arith.constant 0 : index
    %c0_24 = arith.constant 0 : index
    %23 = vector.load %arg6[%c0_22, %c0_23, %c0_24] : memref<1x2x128xf32, #tpu.memory_space<vmem>>, vector<1x1x128xf32>
    %24 = vector.shape_cast %23 : vector<1x1x128xf32> to vector<1x128xf32>
    %25 = vector.shape_cast %22 : vector<1x128xf32> to vector<1x1x128xf32>
    tpu.vector_store %arg6[%c0_22, %c0_23, %c0_24], %25 {strides = array<i32>} : memref<1x2x128xf32, #tpu.memory_space<vmem>>, vector<1x1x128xf32>,
    %26 = arith.mulf %17, %17 : vector<16x128xf32>
    %cst_25 = arith.constant dense<0.000000e+00> : vector<128xf32>
    %27 = vector.multi_reduction <add>, %26, %cst_25 [0] : vector<16x128xf32> to vector<128xf32>
    %28 = vector.shape_cast %27 : vector<128xf32> to vector<1x128xf32>
    %c0_26 = arith.constant 0 : index
    %c1_27 = arith.constant 1 : index
    %c0_28 = arith.constant 0 : index
    %29 = vector.load %arg6[%c0_26, %c1_27, %c0_28] : memref<1x2x128xf32, #tpu.memory_space<vmem>>, vector<1x1x128xf32>
    %30 = vector.shape_cast %29 : vector<1x1x128xf32> to vector<1x128xf32>
    %31 = vector.shape_cast %28 : vector<1x128xf32> to vector<1x1x128xf32>
    tpu.vector_store %arg6[%c0_26, %c1_27, %c0_28], %31 {strides = array<i32>} : memref<1x2x128xf32, #tpu.memory_space<vmem>>, vector<1x1x128xf32>,
    return
  }
  func.func @transform_0(%arg0: i32) -> (i32, i32, i32) {
    %c0_i32 = arith.constant 0 : i32
    %c0_i32_0 = arith.constant 0 : i32
    %c0_i32_1 = arith.constant 0 : i32
    return %arg0, %c0_i32, %c0_i32_0 : i32, i32, i32
  }
  func.func @transform_1(%arg0: i32) -> (i32, i32) {
    %c0_i32 = arith.constant 0 : i32
    %c0_i32_0 = arith.constant 0 : i32
    %c0_i32_1 = arith.constant 0 : i32
    return %c0_i32, %c0_i32_0 : i32, i32
  }
  func.func @transform_2(%arg0: i32) -> (i32, i32) {
    %c0_i32 = arith.constant 0 : i32
    %c0_i32_0 = arith.constant 0 : i32
    %c0_i32_1 = arith.constant 0 : i32
    return %c0_i32, %c0_i32_0 : i32, i32
  }
  func.func @transform_3(%arg0: i32) -> (i32, i32) {
    %c0_i32 = arith.constant 0 : i32
    %c0_i32_0 = arith.constant 0 : i32
    %c0_i32_1 = arith.constant 0 : i32
    return %c0_i32, %c0_i32_0 : i32, i32
  }
  func.func @transform_4(%arg0: i32) -> (i32, i32, i32) {
    %c0_i32 = arith.constant 0 : i32
    %c0_i32_0 = arith.constant 0 : i32
    %c0_i32_1 = arith.constant 0 : i32
    return %arg0, %c0_i32, %c0_i32_0 : i32, i32, i32
  }
  func.func @transform_5(%arg0: i32) -> (i32, i32, i32) {
    %c0_i32 = arith.constant 0 : i32
    %c0_i32_0 = arith.constant 0 : i32
    %c0_i32_1 = arith.constant 0 : i32
    return %arg0, %c0_i32, %c0_i32_0 : i32, i32, i32
  }
}

</mosaic_0001>

<bundles_post_ra>
// kernel: tpu_custom_call.1
= control target key start
LH: loop header
LB: loop body
LE: loop exit
PB: predicated region body
PF: predicated region fallthrough
CT: control target
= control target key end

     0   :  { %11 = vsyncpa [#allocation4], 0  ;;  %s1253_s0 = inlined_call_operand.hbm [shape: f32[2,16,128], index: 0, kind: input, shape index: {}]   ;;  %s1254_s1 = inlined_call_operand.hbm [shape: f32[384,128], index: 1, kind: input, shape index: {}]   ;;  %s1255_s2 = inlined_call_operand.vmem [shape: f32[1,128], index: 2, kind: input, shape index: {}]   ;;  %s1256_s3 = inlined_call_operand.vmem [shape: f32[1,128], index: 3, kind: input, shape index: {}]   ;;  %s1257_s4 = inlined_call_operand.hbm [shape: f32[2,16,128], index: 4, kind: output, shape index: {0}]   ;;  %s1258_s5 = inlined_call_operand.hbm [shape: f32[2,2,128], index: 5, kind: output, shape index: {1}]  }
   0x1   :  { %13 = vsyncpa [#allocation4 + $0x1], 0 }
   0x2   :  { %14 = vsyncpa [#allocation7], 0 }
   0x3   :  { %15 = vsyncpa [#allocation5], 0 }
   0x4   :  { %17 = vsyncpa [#allocation5 + $0x1], 0 }
   0x5   :  { %18 = vsyncpa [#allocation10], 0 }
   0x6   :  { %20 = vsyncpa [#allocation10 + $0x1], 0  ;;  %s1038_s18 = smov 0   ;;  %s1040_s19 = smov 0  }
   0x7   :  { %s1042_s20 = smov 0   ;;  %s1044_s21 = smov 0  }
   0x8 LB: > { %s1059_s22 = sadd.s32 4294967295, %s997_s21   ;;  %s664_s23 = sadd.s32 4294967294, %s997_s21   ;;  %s997_s21 = sphi %s1044_s21, %s1282_s21   ;;  %s993_s20 = sphi %s1042_s20, %s1281_s20   ;;  %s989_s19 = sphi %s1040_s19, %s1280_s19   ;;  %s985_s18 = sphi %s1038_s18, %s1279_s18  }
   0x9   : > { %p46_p0 = scmp.ne.s32.totalorder %s989_s19, %s985_s18  ;;  %p1259_p1 = scmp.eq.s32.totalorder %s1059_s22, 0 }
   0xa   : > { %p139_p3 = scmp.eq.s32.totalorder %s664_s23, 1  ;;  %p665_p5 = scmp.ge.s32.totalorder %s997_s21, 1 }
   0xb   : > { %p1068_p4 = por %p1259_p1, %p46_p0  ;;  %p172_p7 = scmp.lt.s32.totalorder %s997_s21, 3 }
   0xc   : > { %p1073_p6 = por %p139_p3, %p46_p0  ;;  %s999_s27 = smov [#allocation6]  }
   0xd   : > { %s1264_s24 = scalar_select %p1068_p4, 1, 0 }
   0xe   : > { %s1265_s25 = scalar_select %p1073_p6, 1, 0 }
   0xf   : > { %p1078_p8 = pnand %p665_p5, %p172_p7  ;;  %s184_s28 = sshll.u32 %s999_s27, 4  ;;  %s185_s28 = int_to_ptr.vmem [resolvable:$true] %s184_s28 }
  0x10   : > { %s1092_s30 = sadd.s32 1, %s997_s21   ;;  %s33_s6 = sadd.s32 1, %s993_s20 }
  0x11   : > { %s1266_s26 = scalar_select %p1078_p8, 1, 0 }
  0x12   : > { %p788_p9 = pneg %p1078_p8  ;;  %s30_s7 = ssub.s32 %s997_s21, %s1092_s30 }
  0x13   : > { %s856_s8 = scalar_lea.vmem %s185_s28, 6144  ;;  %p864_p5 = scmp.lt.s32.totalorder %s185_s28, %s185_s28 }
  0x14   : > { %p1087_p11 = pnand %p788_p9, %p1259_p1  ;;  %p857_p13 = scmp.ne.s32.totalorder %s185_s28, %s856_s8 }
  0x15   : > { %p865_p7 = scmp.lt.s32.totalorder %s856_s8, %s856_s8 }
  0x16   : > { %p847_p12 = pneg %p1087_p11 }
  0x17   : > { %p866_p10 = por %p865_p7, %p864_p5 }
  0x18   : > { %p859_p0 = pnand %p857_p13, %p847_p12 }
  0x1a   : > { %p860_p3 = pneg %p859_p0 }
  0x1c   : > { %p867_p2 = pnand %p866_p10, %p860_p3 }
  0x1e   : > { %870 = shalt.err (!%p867_p2)
}
  0x1f   : > { %s1260_s9 = smov 128   ;;  %s1001_s10 = smov 8  }
  0x20   : > { %791 = dma.hbm_to_vmem [thread:$0]  (!%p1087_p11), %s1254_s1, 6144, %s185_s28, [#allocation7], %s1260_s9, %s1260_s9, %s1001_s10  }
  0x21   : > { %p31_p2 = scmp.eq.s32.totalorder %s30_s7, 0  ;;  %p40_p9 = scmp.ne.s32.totalorder %s993_s20, %s989_s19 }
  0x22   : > { %p41_p10 = scmp.eq.s32.totalorder %s997_s21, 0  ;;  %p804_p12 = scmp.lt.s32.totalorder %s997_s21, 2 }
  0x23   : > { %s1112_s13 = scalar_select %p31_p2, %s993_s20, %s33_s6  }
  0x24   : > { %p42_p13 = por %p41_p10, %p40_p9  ;;  %p1268_p0 = scmp.eq.s32.totalorder %s1059_s22, 1 }
  0x25   : > { %s204_s15 = sand.u32 1, %s993_s20   ;;  %s685_s16 = sshll.u32 %s997_s21, 8 }
  0x26   : > { %p1116_p3 = por %p1268_p0, %p40_p9  ;;  %s668_s17 = sshll.u32 %s204_s15, 4 }
  0x27   : > { %s1125_s29 = scalar_lea.hbm %s1253_s0, %s685_s16  ;;  %s208_s28 = scalar_lea.vmem [#allocation3], %s668_s17 }
  0x28   : > { %s1269_s14 = scalar_select %p1116_p3, 1, 0 }
  0x29   : > { %s215_s6 = sshll.u32 %s208_s28, 4  ;;  %p1127_p11 = pnand %p804_p12, %p42_p13  ;;  %s1131_s6 = int_to_ptr.vmem [resolvable:$true] %s215_s6 }
  0x2a   : > { %s1133_s8 = scalar_lea.sflag [#allocation4], %s204_s15  ;;  %s871_s11 = scalar_lea.hbm %s1125_s29, 256 }
  0x2b   : > { %p872_p5 = scmp.ne.s32.totalorder %s1125_s29, %s871_s11  ;;  %p873_p7 = pneg %p1127_p11 }
  0x2c   : > { %s876_s17 = scalar_lea.hbm %s1253_s0, 512  ;;  %p877_p10 = scmp.lt.s32.totalorder %s1125_s29, %s1253_s0 }
  0x2d   : > { %p874_p2 = pnand %p873_p7, %p872_p5  ;;  %p878_p12 = scmp.lt.s32.totalorder %s876_s17, %s871_s11 }
  0x2f   : > { %p875_p9 = pneg %p874_p2  ;;  %p879_p13 = por %p878_p12, %p877_p10 }
  0x31   : > { %p880_p0 = pnand %p879_p13, %p875_p9 }
  0x33   : > { %883 = shalt.err (!%p880_p0)
}
  0x34   : > { %s884_s15 = scalar_lea.vmem %s1131_s6, 256  ;;  %s1002_s28 = smov [#allocation3]  }
  0x35   : > { %p885_p1 = scmp.ne.s32.totalorder %s1131_s6, %s884_s15  ;;  %s889_s9 = sshll.u32 %s1002_s28, 4  ;;  %s890_s9 = int_to_ptr.vmem [resolvable:$false] %s889_s9 }
  0x36   : > { %s891_s12 = scalar_lea.vmem %s890_s9, 512  ;;  %p892_p2 = scmp.lt.s32.totalorder %s1131_s6, %s890_s9 }
  0x37   : > { %p887_p6 = pnand %p885_p1, %p873_p7  ;;  %p893_p3 = scmp.lt.s32.totalorder %s891_s12, %s884_s15 }
  0x39   : > { %p888_p5 = pneg %p887_p6  ;;  %p894_p4 = por %p893_p3, %p892_p2 }
  0x3b   : > { %p895_p8 = pnand %p894_p4, %p888_p5 }
  0x3d   : > { %898 = shalt.err (!%p895_p8)
}
  0x3e   : > { %s1271_s11 = smov 128   ;;  %p1272_p1 = scmp.ne.s32.totalorder %s1266_s26, 0 }
  0x3f   : > { %795 = dma.hbm_to_vmem [thread:$0]  (!%p1127_p11), %s1125_s29, 256, %s1131_s6, %s1133_s8, %s1271_s11, %s1271_s11, %s1001_s10  }
  0x40   : > { %227 = sbr.rel (%p1272_p1) target bundleno = 348 (0x15c), region = 36  ;;  %s1160_s16 = sand.u32 (!%p1272_p1), 1, %s989_s19  }
  0x41   : > { %s672_s9 = sshll.u32 (!%p1272_p1), %s1160_s16, 4  ;;  %s230_s17 = scalar_lea.sflag (!%p1272_p1), [#allocation4], %s1160_s16 }
  0x42   : > { %s1166_s7 = scalar_lea.vmem (!%p1272_p1), [#allocation3], %s672_s9  ;;  %p1273_p4 = scmp.ne.s32.totalorder (!%p1272_p1), %s1264_s24, 0 }
  0x45   : > { %968 = dma.done.wait (%p1273_p4), %s230_s17, 256  }
  0x46   : > { %970 = vsyncadd (%p1273_p4), %s230_s17, 4294967040  ;;  %p1274_p6 = scmp.eq.s32.totalorder %s1059_s22, 0 }
  0x48   : > { %972 = dma.done.wait (%p1274_p6), [#allocation7], 6144   ;;  %p1275_p8 = pmov %p1274_p6 }
  0x49   : > { %v1003_v0 = vmov 0.0   ;;  %v330_v1 = vld [vmem:[#allocation6 + $0xf8] sm:$0xff]  ;;  %v329_v3 = vld [vmem:[#allocation6 + $0xf0] sm:$0xff]  ;;  %v328_v6 = vld [vmem:[#allocation6 + $0xe8] sm:$0xff]  ;;  %s261_s6 = scalar_lea.vmem [#allocation8], %s672_s9  ;;  %s686_s23 = sshll.u32 %s1059_s22, 8 }
  0x4a   : > { %974 = vsyncadd (%p1275_p8), [#allocation7], 4294961152  ;;  %289 = vst [vmem:[#allocation2] sm:$0x1] %v1003_v0  ;;  %v314_v2 = vld [vmem:[#allocation6 + $0x78] sm:$0xff]  ;;  %687 = vmatprep.subr.mxu0 %v330_v1  ;;  %v313_v5 = vld [vmem:[#allocation6 + $0x70] sm:$0xff]  ;;  %s1192_s28 = scalar_lea.hbm %s1257_s4, %s686_s23 }
  0x4b   : > { %290 = vst [vmem:[#allocation2 + $0x11] sm:$0x1] %v1003_v0  ;;  %v346_v4 = vld [vmem:[#allocation6 + $0x178] sm:$0xff]  ;;  %688 = vmatpush3.msra.mxu0 %v314_v2  ;;  %v345_v7 = vld [vmem:[#allocation6 + $0x170] sm:$0xff]  ;;  %v312_v8 = vld [vmem:[#allocation6 + $0x68] sm:$0xff]  ;;  %s536_s8 = sshll.u32 %s261_s6, 4  ;;  %s1187_s8 = int_to_ptr.vmem [resolvable:$true] %s536_s8 }
  0x4c   : > { %743 = vmatprep.subr.mxu1 %v346_v4  ;;  %689 = vmatprep.subr.mxu0 %v329_v3  ;;  %v344_v9 = vld [vmem:[#allocation6 + $0x168] sm:$0xff]  ;;  %v327_v10 = vld [vmem:[#allocation6 + $0xe0] sm:$0xff]  ;;  %v326_v13 = vld [vmem:[#allocation6 + $0xd8] sm:$0xff]  ;;  %s518_s12 = scalar_lea.sflag [#allocation5], %s1160_s16  ;;  %s899_s11 = scalar_lea.vmem %s1187_s8, 256 }
  0x4d   : > { %744 = vmatpush3.msra.mxu1 %v346_v4  ;;  %690 = vmatpush3.msra.mxu0 %v313_v5  ;;  %v311_v11 = vld [vmem:[#allocation6 + $0x60] sm:$0xff]  ;;  %v310_v14 = vld [vmem:[#allocation6 + $0x58] sm:$0xff]  ;;  %v325_v16 = vld [vmem:[#allocation6 + $0xd0] sm:$0xff]  ;;  %p900_p3 = scmp.ne.s32.totalorder %s1187_s8, %s899_s11  ;;  %p1276_p11 = scmp.ne.s32.totalorder %s1269_s14, 0 }
  0x4e   : > { %745 = vmatprep.subr.mxu1 %v345_v7  ;;  %691 = vmatprep.subr.mxu0 %v328_v6  ;;  %v343_v12 = vld [vmem:[#allocation6 + $0x160] sm:$0xff]  ;;  %v342_v15 = vld [vmem:[#allocation6 + $0x158] sm:$0xff]  ;;  %v309_v17 = vld [vmem:[#allocation6 + $0x50] sm:$0xff]  ;;  %s1004_s9 = smov [#allocation8]  }
  0x4f   : > { %746 = vmatpush3.msra.mxu1 %v345_v7  ;;  %692 = vmatpush3.msra.mxu0 %v312_v8  ;;  %v341_v18 = vld [vmem:[#allocation6 + $0x150] sm:$0xff]  ;;  %v324_v19 = vld [vmem:[#allocation6 + $0xc8] sm:$0xff]  ;;  %v323_v22 = vld [vmem:[#allocation6 + $0xc0] sm:$0xff]  ;;  %p901_p7 = pnand %p900_p3, %p1276_p11  ;;  %s903_s17 = sshll.u32 %s1004_s9, 4  ;;  %s904_s17 = int_to_ptr.vmem [resolvable:$false] %s903_s17 }
  0x50   : > { %747 = vmatprep.subr.mxu1 %v344_v9  ;;  %693 = vmatprep.subr.mxu0 %v327_v10  ;;  %v308_v20 = vld [vmem:[#allocation6 + $0x48] sm:$0xff]  ;;  %v307_v23 = vld [vmem:[#allocation6 + $0x40] sm:$0xff]  ;;  %v322_v25 = vld [vmem:[#allocation6 + $0xb8] sm:$0xff]  ;;  %p906_p10 = scmp.lt.s32.totalorder %s1187_s8, %s904_s17 }
  0x51   : > { %748 = vmatpush3.msra.mxu1 %v344_v9  ;;  %694 = vmatpush3.msra.mxu0 %v311_v11  ;;  %v340_v21 = vld [vmem:[#allocation6 + $0x148] sm:$0xff]  ;;  %v339_v24 = vld [vmem:[#allocation6 + $0x140] sm:$0xff]  ;;  %v306_v26 = vld [vmem:[#allocation6 + $0x38] sm:$0xff]  ;;  %p902_p9 = pneg %p901_p7 }
  0x52   : > { %749 = vmatprep.subr.mxu1 %v343_v12  ;;  %695 = vmatprep.subr.mxu0 %v326_v13  ;;  %v338_v27 = vld [vmem:[#allocation6 + $0x138] sm:$0xff]  ;;  %v269_v28 = vld [vmem:[%s1166_s7] sm:$0xff]  ;;  %v676_v30 = vld [vmem:[%s1255_s2] ss:$0 sm:$0xff] }
  0x53   : > { %750 = vmatpush3.msra.mxu1 %v343_v12  ;;  %696 = vmatpush3.msra.mxu0 %v310_v14  ;;  %v321_v29 = vld [vmem:[#allocation6 + $0xb0] sm:$0xff]  ;;  %v677_v31 = vld [vmem:[%s1256_s3] ss:$0 sm:$0xff]  ;;  %v278_v34 = vmul.f32 %v676_v30, %v269_v28  ;;  %v319_v41 = vld [vmem:[#allocation6 + $0xa0] sm:$0xff] }
  0x54   : > { %751 = vmatprep.subr.mxu1 %v342_v15  ;;  %697 = vmatprep.subr.mxu0 %v325_v16  ;;  %v305_v32 = vld [vmem:[#allocation6 + $0x30] sm:$0xff]  ;;  %v270_v35 = vld [vmem:[%s1166_s7 + $0x8] sm:$0xff]  ;;  %v303_v43 = vld [vmem:[#allocation6 + $0x20] sm:$0xff]  ;;  %s905_s7 = scalar_lea.vmem %s904_s17, 512 }
  0x55   : > { %752 = vmatpush3.msra.mxu1 %v342_v15  ;;  %698 = vmatpush3.msra.mxu0 %v309_v17  ;;  %v337_v33 = vld [vmem:[#allocation6 + $0x130] sm:$0xff]  ;;  %v320_v36 = vld [vmem:[#allocation6 + $0xa8] sm:$0xff]  ;;  %v279_v37 = vmul.f32 %v676_v30, %v270_v35  ;;  %v287_v40 = vadd.f32 %v677_v31, %v278_v34  ;;  %v335_v44 = vld [vmem:[#allocation6 + $0x120] sm:$0xff]  ;;  %p907_p12 = scmp.lt.s32.totalorder %s905_s7, %s899_s11 }
  0x56   : > { %753 = vmatprep.subr.mxu1 %v341_v18  ;;  %699 = vmatprep.subr.mxu0 %v324_v19  ;;  %v304_v38 = vld [vmem:[#allocation6 + $0x28] sm:$0xff]  ;;  %v318_v45 = vld [vmem:[#allocation6 + $0x98] sm:$0xff]  ;;  %v317_v48 = vld [vmem:[#allocation6 + $0x90] sm:$0xff] }
  0x57   : > { %754 = vmatpush3.msra.mxu1 %v341_v18  ;;  %700 = vmatpush3.msra.mxu0 %v308_v20  ;;  %v336_v39 = vld [vmem:[#allocation6 + $0x128] sm:$0xff]  ;;  %v288_v42 = vadd.f32 %v677_v31, %v279_v37  ;;  %291 = vst [vmem:[#allocation2 + $0x1] sm:$0xff] %v287_v40  ;;  %v302_v46 = vld [vmem:[#allocation6 + $0x18] sm:$0xff]  ;;  %v301_v49 = vld [vmem:[#allocation6 + $0x10] sm:$0xff]  ;;  %p908_p13 = por %p907_p12, %p906_p10 }
  0x58   : > { %755 = vmatprep.subr.mxu1 %v340_v21  ;;  %701 = vmatprep.subr.mxu0 %v323_v22  ;;  %v334_v47 = vld [vmem:[#allocation6 + $0x118] sm:$0xff]  ;;  %v333_v50 = vld [vmem:[#allocation6 + $0x110] sm:$0xff]  ;;  %v316_v51 = vld [vmem:[#allocation6 + $0x88] sm:$0xff] }
  0x59   : > { %756 = vmatpush3.msra.mxu1 %v340_v21  ;;  %702 = vmatpush3.msra.mxu0 %v307_v23  ;;  %292 = vst [vmem:[#allocation2 + $0x9] sm:$0xff] %v288_v42  ;;  %v300_v52 = vld [vmem:[#allocation6 + $0x8] sm:$0xff]  ;;  %v315_v54 = vld [vmem:[#allocation6 + $0x80] sm:$0xff]  ;;  %p909_p0 = pnand %p908_p13, %p902_p9 }
  0x5a   : > { %757 = vmatprep.subr.mxu1 %v339_v24  ;;  %703 = vmatprep.subr.mxu0 %v322_v25  ;;  %v332_v53 = vld [vmem:[#allocation6 + $0x108] sm:$0xff]  ;;  %v299_v55 = vld [vmem:[#allocation6] sm:$0xff] }
  0x5b   : > { %758 = vmatpush3.msra.mxu1 %v339_v24  ;;  %704 = vmatpush3.msra.mxu0 %v306_v26  ;;  %v331_v57 = vld [vmem:[#allocation6 + $0x100] sm:$0xff] }
  0x5c   : > { %759 = vmatprep.subr.mxu1 %v338_v27  ;;  %705 = vmatprep.subr.mxu0 %v321_v29 }
  0x5d   : > { %760 = vmatpush3.msra.mxu1 %v338_v27  ;;  %706 = vmatpush3.msra.mxu0 %v305_v32 }
  0x5e   : > { %761 = vmatprep.subr.mxu1 %v337_v33  ;;  %707 = vmatprep.subr.mxu0 %v320_v36  ;;  %v293_v56 = vld [vmem:[#allocation2] sm:$0xff] }
  0x5f   : > { %762 = vmatpush3.msra.mxu1 %v337_v33  ;;  %708 = vmatpush3.msra.mxu0 %v304_v38 }
  0x60   : > { %763 = vmatprep.subr.mxu1 %v336_v39  ;;  %709 = vmatprep.subr.mxu0 %v319_v41  ;;  %v297_v58 = vld [vmem:[#allocation2 + $0x2] sm:$0xff]  ;;  %v298_v59 = vld [vmem:[#allocation2 + $0xa] sm:$0xff] }
  0x61   : > { %764 = vmatpush3.msra.mxu1 %v336_v39  ;;  %710 = vmatpush3.msra.mxu0 %v303_v43  ;;  %v294_v60 = vld [vmem:[#allocation2 + $0x8] sm:$0xff] }
  0x62   : > { %765 = vmatprep.subr.mxu1 %v335_v44  ;;  %711 = vmatprep.subr.mxu0 %v318_v45 }
  0x63   : > { %766 = vmatpush3.msra.mxu1 %v335_v44  ;;  %712 = vmatpush3.msra.mxu0 %v302_v46 }
  0x64   : > { %767 = vmatprep.subr.mxu1 %v334_v47  ;;  %713 = vmatprep.subr.mxu0 %v317_v48 }
  0x65   : > { %768 = vmatpush3.msra.mxu1 %v334_v47  ;;  %714 = vmatpush3.msra.mxu0 %v301_v49 }
  0x66   : > { %769 = vmatprep.subr.mxu1 %v333_v50  ;;  %715 = vmatprep.subr.mxu0 %v316_v51 }
  0x67   : > { %770 = vmatpush3.msra.mxu1 %v333_v50  ;;  %716 = vmatpush3.msra.mxu0 %v300_v52 }
  0x68   : > { %771 = vmatprep.subr.mxu1 %v332_v53  ;;  %717 = vmatprep.subr.mxu0 %v315_v54 }
  0x69   : > { %411 = vmatprep.mubr.f32.mxu0 %v287_v40  ;;  %718 = vmatpush3.msra.mxu0 %v299_v55 }
  0x6a   : > { %772 = vmatpush3.msra.mxu1 %v332_v53  ;;  %412 = vmatmul.mubr.f32.vlgmr.msra.gmra.mxu0 %v293_v56 }
  0x6b   : > { %773 = vmatprep.subr.mxu1 %v331_v57  ;;  %775 = vmatprep.mubr.f32.mxu1 %v297_v58 }
  0x6c   : > { %774 = vmatpush3.msra.mxu1 %v331_v57  ;;  %416 = vmatprep.mubr.f32.mxu0 %v288_v42 }
  0x6d   : > { %776 = vmatmul.mubr.f32.vlgmr.msra.gmra.mxu1 %v298_v59 }
  0x6e   : > { %417 = vmatmul.mubr.f32.gmra.mxu0 %v294_v60 }
 0x12a   : > { %v719_v61 = vpop.f32.mrf.mxu0 }
 0x12c   : > { %v720_v62 = vpop.f32.mrf.mxu0 }
 0x12d   : > { %v777_v63 = vpop.f32.mrf.mxu1  ;;  %v721_v0 = vadd.f32 %v720_v62, %v719_v61 }
 0x12e   : > { %v722_v1 = vpop.f32.mrf.mxu0 }
 0x12f   : > { %v488_v2 = vpop.f32.mrf.mxu1 }
 0x130   : > { %v489_v3 = vadd.f32 %v721_v0, %v488_v2  ;;  %v723_v4 = vpop.f32.mrf.mxu0 }
 0x131   : > { %v724_v5 = vadd.f32 %v723_v4, %v722_v1 }
 0x132   : > { %497 = vst [vmem:[%s261_s6] sm:$0xff] %v489_v3  ;;  %v507_v7 = vmul.f32 %v489_v3, %v489_v3 }
 0x133   : > { %v494_v6 = vadd.f32 %v777_v63, %v724_v5 }
 0x135   : > { %498 = vst [vmem:[%s261_s6 + $0x8] sm:$0xff] %v494_v6  ;;  %v499_v8 = vadd.f32 %v494_v6, %v489_v3  ;;  %v508_v9 = vmul.f32 %v494_v6, %v494_v6 }
 0x136   : > { %912 = shalt.err (!%p909_p0)
}
 0x137   : > { %s913_s24 = scalar_lea.hbm %s1192_s28, 256  ;;  %s917_s29 = scalar_lea.hbm %s1257_s4, 512 }
 0x138   : > { %p914_p5 = scmp.ne.s32.totalorder %s1192_s28, %s913_s24  ;;  %p918_p4 = scmp.lt.s32.totalorder %s1192_s28, %s1257_s4 }
 0x139   : > { %p919_p6 = scmp.lt.s32.totalorder %s917_s29, %s913_s24 }
 0x13a   : > { %p915_p2 = pnand %p914_p5, %p1276_p11 }
 0x13b   : > { %p920_p8 = por %p919_p6, %p918_p4 }
 0x13c   : > { %p916_p1 = pneg %p915_p2 }
 0x13e   : > { %p921_p3 = pnand %p920_p8, %p916_p1 }
 0x140   : > { %924 = shalt.err (!%p921_p3)
}
 0x141   : > { %s1005_s27 = smov 128   ;;  %s1006_s15 = smov 8   ;;  %v500_v10 = vrot.slane %v499_v8, 4  ;;  %v509_v11 = vadd.f32 %v508_v9, %v507_v7 }
 0x142   : > { %784 = dma.vmem_to_hbm [thread:$0]  (%p1276_p11), %s1187_s8, 256, %s1192_s28, %s518_s12, %s1005_s27, %s1005_s27, %s1006_s15  }
 0x143   : > { %v501_v12 = vadd.f32 %v500_v10, %v499_v8  ;;  %v510_v13 = vrot.slane %v509_v11, 4  ;;  %s675_s11 = sshll.u32 %s1160_s16, 1  ;;  %s682_s9 = sshll.u32 %s1059_s22, 5 }
 0x144   : > { %s268_s17 = scalar_lea.vmem [#allocation9], %s675_s11  ;;  %s550_s12 = scalar_lea.hbm %s1258_s5, %s682_s9 }
 0x145   : > { %v502_v14 = vrot.slane %v501_v12, 2  ;;  %v511_v15 = vadd.f32 %v510_v13, %v509_v11  ;;  %s552_s7 = sshll.u32 %s268_s17, 4  ;;  %s523_s24 = scalar_lea.sflag [#allocation10], %s1160_s16  ;;  %s553_s7 = int_to_ptr.vmem [resolvable:$true] %s552_s7 }
 0x146   : > { %s925_s26 = scalar_lea.vmem %s553_s7, 32  ;;  %s1007_s10 = smov [#allocation9]  }
 0x147   : > { %v503_v16 = vadd.f32 %v502_v14, %v501_v12  ;;  %v512_v17 = vrot.slane %v511_v15, 2  ;;  %p926_p7 = scmp.ne.s32.totalorder %s553_s7, %s925_s26  ;;  %s929_s22 = sshll.u32 %s1007_s10, 4  ;;  %s930_s22 = int_to_ptr.vmem [resolvable:$false] %s929_s22 }
 0x148   : > { %s931_s29 = scalar_lea.vmem %s930_s22, 64  ;;  %p932_p12 = scmp.lt.s32.totalorder %s553_s7, %s930_s22 }
 0x149   : > { %v504_v18 = vrot.slane %v503_v16, 1  ;;  %v513_v19 = vadd.f32 %v512_v17, %v511_v15  ;;  %p927_p9 = pnand %p926_p7, %p1276_p11  ;;  %p933_p13 = scmp.lt.s32.totalorder %s931_s29, %s925_s26 }
 0x14b   : > { %v505_v20 = vadd.f32 %v504_v18, %v503_v16  ;;  %v514_v21 = vrot.slane %v513_v19, 1  ;;  %p928_p10 = pneg %p927_p9  ;;  %p934_p0 = por %p933_p13, %p932_p12 }
 0x14d   : > { %506 = vst [vmem:[%s268_s17] sm:$0x1] %v505_v20  ;;  %v515_v22 = vadd.f32 %v514_v21, %v513_v19  ;;  %p935_p5 = pnand %p934_p0, %p928_p10 }
 0x14f   : > { %516 = vst [vmem:[%s268_s17 + $0x1] sm:$0x1] %v515_v22 }
 0x150   : > { %938 = shalt.err (!%p935_p5)
}
 0x151   : > { %s939_s6 = scalar_lea.hbm %s550_s12, 32  ;;  %s943_s27 = scalar_lea.hbm %s1258_s5, 64 }
 0x152   : > { %p940_p2 = scmp.ne.s32.totalorder %s550_s12, %s939_s6  ;;  %p944_p6 = scmp.lt.s32.totalorder %s550_s12, %s1258_s5 }
 0x153   : > { %p945_p8 = scmp.lt.s32.totalorder %s943_s27, %s939_s6 }
 0x154   : > { %p941_p1 = pnand %p940_p2, %p1276_p11 }
 0x155   : > { %p946_p3 = por %p945_p8, %p944_p6 }
 0x156   : > { %p942_p4 = pneg %p941_p1 }
 0x158   : > { %p947_p7 = pnand %p946_p3, %p942_p4 }
 0x15a   : > { %950 = shalt.err (!%p947_p7)
}
 0x15b   : > { %785 = dma.vmem_to_hbm [thread:$0]  (%p1276_p11), %s553_s7, 32, %s550_s12, %s523_s24  }
 0x15c PF: > { %s564_s9 = sand.u32 1, %s985_s18   ;;  %p1277_p9 = scmp.ne.s32.totalorder %s1265_s25, 0 }
 0x15d   : > { %p1278_p10 = scmp.ge.s32.totalorder %s997_s21, 2  ;;  %s565_s17 = scalar_lea.sflag [#allocation5], %s564_s9 }
 0x15f   : > { %p797_p12 = pnand %p1278_p10, %p1277_p9 }
 0x161   : > { %p798_p13 = pneg %p797_p12 }
 0x163   : > { %976 = dma.done.wait (%p798_p13), %s565_s17, 256  }
 0x164   : > { %978 = vsyncadd (%p798_p13), %s565_s17, 4294967040  ;;  %s574_s8 = scalar_lea.sflag [#allocation10], %s564_s9 }
 0x165   : > { %980 = dma.done.wait (%p798_p13), %s574_s8, 32  }
 0x166   : > { %982 = vsyncadd (%p798_p13), %s574_s8, 4294967264  ;;  %p23_p11 = scmp.ge.s32.totalorder %s1092_s30, 4   ;;  %s1279_s18 = smov %s989_s19 }
 0x167   : > { %s1280_s19 = smov %s993_s20  ;;  %s1281_s20 = smov %s1112_s13 }
 0x168   : > { %s1282_s21 = smov %s1092_s30  ;;  %25 = sbr.rel (!%p23_p11) target bundleno = 8 (0x8), region = 102 }
 0x16d   :  { %579 = vsyncpa [#allocation4], 1 }
 0x16e   :  { %581 = vsyncpa [#allocation4 + $0x1], 1 }
 0x16f   :  { %582 = vsyncpa [#allocation7], 1 }
 0x170   :  { %583 = vsyncpa [#allocation5], 1 }
 0x171   :  { %585 = vsyncpa [#allocation5 + $0x1], 1 }
 0x172   :  { %586 = vsyncpa [#allocation10], 1 }
 0x173   :  { %588 = vsyncpa [#allocation10 + $0x1], 1 }

</bundles_post_ra>
